<compile_context>
chip_gen: v6e
topology: v6e:2x2x1
jax: 0.10.0
libtpu: 0.0.40
codegen_flags: <defaults>
</compile_context>

<pallas_src>
import math
from functools import partial

import jax
import jax.numpy as jnp
from jax.experimental import pallas as pl
from jax.experimental.pallas import tpu as pltpu

# ---- model hyper-parameters (small, consistent with the module) -------------
D_MODEL = 32
NUM_HEADS = 4
D_QUERIES = 8   # == d_keys
D_VALUES = 8


# ---------------- fused Pallas kernel -----------------------------------------
def _fused_mha_kernel(q_ref, kv_ref, mask_ref,
                      wq_ref, bq_ref, wkv_ref, bkv_ref, wo_ref, bo_ref,
                      o_ref, *, num_heads, d_q, d_v, causal):
    f32 = jnp.float32
    x_q = q_ref[0]                       # (T_q, d_model)
    x_kv = kv_ref[0]                     # (T_kv, d_model)
    T_q, T_kv = x_q.shape[0], x_kv.shape[0]
    d_k = d_q

    # Fused projections; 1/sqrt(d_k) is already folded into wq/bq by the wrapper.
    pq = jnp.dot(x_q, wq_ref[...], preferred_element_type=f32) + bq_ref[...]     # (T_q, H*d_q)
    pkv = jnp.dot(x_kv, wkv_ref[...], preferred_element_type=f32) + bkv_ref[...]  # (T_kv, H*(d_k+d_v))

    # Single combined additive mask bias (padding + optional causal), finite neg.
    masked = mask_ref[0] > 0                                    # (1, T_kv) bool
    if causal:
        row = jax.lax.broadcasted_iota(jnp.int32, (T_q, T_kv), 0)
        col = jax.lax.broadcasted_iota(jnp.int32, (T_q, T_kv), 1)
        masked = jnp.logical_or(masked, col > row)              # (T_q, T_kv)
    bias = jnp.where(masked, f32(-1e30), f32(0.0))

    dn = (((1,), (1,)), ((), ()))   # contract last dims of q/k, no explicit k.T

    d_out = wo_ref.shape[1]
    acc = jnp.zeros((T_q, d_out), f32)
    # TODO(synk): heads are statically unrolled (H=4) with contiguous column
    # slices instead of one batched contraction; the tiny per-head MXU pushes
    # are inherent to these toy head dims.
    for h in range(num_heads):
        qh = pq[:, h * d_q:(h + 1) * d_q]                                   # (T_q, d_q)
        kh = pkv[:, h * d_k:(h + 1) * d_k]                                  # (T_kv, d_k)
        vh = pkv[:, num_heads * d_k + h * d_v: num_heads * d_k + (h + 1) * d_v]

        s = jax.lax.dot_general(qh, kh, dn, preferred_element_type=f32) + bias
        m = jnp.max(s, axis=-1, keepdims=True)
        p = jnp.exp(s - m)
        p = p * pl.reciprocal(jnp.sum(p, axis=-1, keepdims=True), approx=True)
        oh = jnp.dot(p, vh, preferred_element_type=f32)                     # (T_q, d_v)
        # accumulate head contribution through its slice of the output projection
        acc = acc + jnp.dot(oh, wo_ref[h * d_v:(h + 1) * d_v, :],
                            preferred_element_type=f32)

    o_ref[0] = (acc + bo_ref[...]).astype(o_ref.dtype)


# ---------------- wrapper ------------------------------------------------------
def multi_head_attention(params, q_seq, kv_seq, pad_mask, apply_causal_mask=False):
    B, T_q, d_model = q_seq.shape
    T_kv = kv_seq.shape[1]
    H, d_q, d_v = NUM_HEADS, D_QUERIES, D_VALUES
    d_k = d_q
    scale = 1.0 / math.sqrt(d_k)

    # Fold the attention scale into the Q projection (weights-only, one-time).
    wq = params["wq"] * scale
    bq = (params["bq"] * scale).reshape(1, H * d_q)
    wkv = params["wkv"]
    bkv = params["bkv"].reshape(1, H * (d_k + d_v))
    wo = params["wo"]
    bo = params["bo"].reshape(1, d_model)
    mask_i32 = pad_mask.astype(jnp.int32).reshape(B, 1, T_kv)

    kernel = partial(_fused_mha_kernel, num_heads=H, d_q=d_q, d_v=d_v,
                     causal=bool(apply_causal_mask))

    return pl.pallas_call(
        kernel,
        out_shape=jax.ShapeDtypeStruct((B, T_q, d_model), q_seq.dtype),
        grid=(B,),
        in_specs=[
            pl.BlockSpec((1, T_q, d_model), lambda b: (b, 0, 0)),     # query seq
            pl.BlockSpec((1, T_kv, d_model), lambda b: (b, 0, 0)),    # key/value seq
            pl.BlockSpec((1, 1, T_kv), lambda b: (b, 0, 0)),          # pad mask
            pl.BlockSpec((d_model, H * d_q), lambda b: (0, 0)),       # wq (pre-scaled)
            pl.BlockSpec((1, H * d_q), lambda b: (0, 0)),             # bq (pre-scaled)
            pl.BlockSpec((d_model, H * (d_k + d_v)), lambda b: (0, 0)),  # wkv
            pl.BlockSpec((1, H * (d_k + d_v)), lambda b: (0, 0)),        # bkv
            pl.BlockSpec((H * d_v, d_model), lambda b: (0, 0)),       # wo
            pl.BlockSpec((1, d_model), lambda b: (0, 0)),             # bo
        ],
        out_specs=pl.BlockSpec((1, T_q, d_model), lambda b: (b, 0, 0)),
        compiler_params=pltpu.CompilerParams(
            dimension_semantics=("parallel",)),
    )(q_seq, kv_seq, mask_i32, wq, bq, wkv, bkv, wo, bo)


# ---------------- deterministic parameter init (PyTorch-Linear style) ----------
def init_params(key):
    ks = jax.random.split(key, 6)

    def lin(kw, kb, d_in, d_out):
        bound = 1.0 / math.sqrt(d_in)
        w = jax.random.uniform(kw, (d_in, d_out), jnp.float32, -bound, bound)
        b = jax.random.uniform(kb, (d_out,), jnp.float32, -bound, bound)
        return w, b

    wq, bq = lin(ks[0], ks[1], D_MODEL, NUM_HEADS * D_QUERIES)
    wkv, bkv = lin(ks[2], ks[3], D_MODEL, NUM_HEADS * (D_QUERIES + D_VALUES))
    wo, bo = lin(ks[4], ks[5], NUM_HEADS * D_VALUES, D_MODEL)
    return dict(wq=wq, bq=bq, wkv=wkv, bkv=bkv, wo=wo, bo=bo)


# ---------------- pure-JAX reference (mirrors the PyTorch forward) -------------
def reference_mha(params, q_seq, kv_seq, pad_mask, apply_causal_mask):
    B, T_q, _ = q_seq.shape
    T_kv = kv_seq.shape[1]
    H, d_q, d_v = NUM_HEADS, D_QUERIES, D_VALUES
    d_k = d_q
    pq = q_seq @ params["wq"] + params["bq"]
    pkv = kv_seq @ params["wkv"] + params["bkv"]
    pk, pv = pkv[..., : H * d_k], pkv[..., H * d_k:]
    q = pq.reshape(B, T_q, H, d_q).transpose(0, 2, 1, 3)
    k = pk.reshape(B, T_kv, H, d_k).transpose(0, 2, 1, 3)
    v = pv.reshape(B, T_kv, H, d_v).transpose(0, 2, 1, 3)
    s = jnp.einsum("bhqd,bhkd->bhqk", q, k) / math.sqrt(d_k)
    s = jnp.where(pad_mask[:, None, None, :], -jnp.inf, s)
    if apply_causal_mask:
        causal = jnp.tril(jnp.ones((T_q, T_kv), bool))
        s = jnp.where(~causal, -jnp.inf, s)
    p = jax.nn.softmax(s, axis=-1)
    o = jnp.einsum("bhqk,bhkd->bhqd", p, v)
    o = o.transpose(0, 2, 1, 3).reshape(B, T_q, H * d_v)
    return o @ params["wo"] + params["bo"]


if __name__ == "__main__":
    B, T_q, T_kv = 2, 8, 16

    key = jax.random.PRNGKey(0)
    kp, kq, kkv = jax.random.split(key, 3)
    params = init_params(kp)
    query_sequence = jax.random.normal(kq, (B, T_q, D_MODEL), jnp.float32)
    key_value_sequence = jax.random.normal(kkv, (B, T_kv, D_MODEL), jnp.float32)
    # padding mask: True = masked. Mask the last 3 kv positions of batch 1.
    key_value_padding_mask = jnp.zeros((B, T_kv), bool).at[1, -3:].set(True)

    ok = True
    for causal in (True, False):
        out = multi_head_attention(params, query_sequence, key_value_sequence,
                                   key_value_padding_mask,
                                   apply_causal_mask=causal)
        out = jax.block_until_ready(out)
        ref = reference_mha(params, query_sequence, key_value_sequence,
                            key_value_padding_mask, causal)
        assert out.shape == (B, T_q, D_MODEL)
        ok &= bool(jnp.allclose(out, ref, atol=1e-3, rtol=1e-3))

    assert ok
    print("KERNEL_OK")
</pallas_src>

<mosaic_0001>
module attributes {stable_mosaic.version = 11 : i64} {
  func.func @_fused_mha_kernel(%arg0: i32, %arg1: memref<1x8x32xf32, #tpu.memory_space<vmem>>, %arg2: memref<1x16x32xf32, #tpu.memory_space<vmem>>, %arg3: memref<1x1x16xi32, #tpu.memory_space<vmem>>, %arg4: memref<32x32xf32, #tpu.memory_space<vmem>>, %arg5: memref<1x32xf32, #tpu.memory_space<vmem>>, %arg6: memref<32x64xf32, #tpu.memory_space<vmem>>, %arg7: memref<1x64xf32, #tpu.memory_space<vmem>>, %arg8: memref<32x32xf32, #tpu.memory_space<vmem>>, %arg9: memref<1x32xf32, #tpu.memory_space<vmem>>, %arg10: memref<1x8x32xf32, #tpu.memory_space<vmem>>) attributes {dimension_semantics = [#tpu.dimension_semantics<parallel>], iteration_bounds = array<i64: 2>, scalar_prefetch = 0 : i64, scratch_operands = 0 : i64, tpu.core_type = #tpu.core_type<tc>, window_params = [{transform_indices = @transform_0, window_bounds = array<i64: 1, 8, 32>}, {transform_indices = @transform_1, window_bounds = array<i64: 1, 16, 32>}, {transform_indices = @transform_2, window_bounds = array<i64: 1, 1, 16>}, {pipeline_mode = #tpu.pipeline_mode<synchronous>, transform_indices = @transform_3, window_bounds = array<i64: 32, 32>}, {pipeline_mode = #tpu.pipeline_mode<synchronous>, transform_indices = @transform_4, window_bounds = array<i64: 1, 32>}, {pipeline_mode = #tpu.pipeline_mode<synchronous>, transform_indices = @transform_5, window_bounds = array<i64: 32, 64>}, {pipeline_mode = #tpu.pipeline_mode<synchronous>, transform_indices = @transform_6, window_bounds = array<i64: 1, 64>}, {pipeline_mode = #tpu.pipeline_mode<synchronous>, transform_indices = @transform_7, window_bounds = array<i64: 32, 32>}, {pipeline_mode = #tpu.pipeline_mode<synchronous>, transform_indices = @transform_8, window_bounds = array<i64: 1, 32>}, {transform_indices = @transform_9, window_bounds = array<i64: 1, 8, 32>}]} {
    %c0 = arith.constant 0 : index
    %c0_0 = arith.constant 0 : index
    %c0_1 = arith.constant 0 : index
    %0 = vector.load %arg1[%c0, %c0_0, %c0_1] : memref<1x8x32xf32, #tpu.memory_space<vmem>>, vector<1x8x32xf32>
    %1 = vector.shape_cast %0 : vector<1x8x32xf32> to vector<8x32xf32>
    %c0_2 = arith.constant 0 : index
    %c0_3 = arith.constant 0 : index
    %c0_4 = arith.constant 0 : index
    %2 = vector.load %arg2[%c0_2, %c0_3, %c0_4] : memref<1x16x32xf32, #tpu.memory_space<vmem>>, vector<1x16x32xf32>
    %3 = vector.shape_cast %2 : vector<1x16x32xf32> to vector<16x32xf32>
    %c0_5 = arith.constant 0 : index
    %c0_6 = arith.constant 0 : index
    %4 = vector.load %arg4[%c0_5, %c0_6] : memref<32x32xf32, #tpu.memory_space<vmem>>, vector<32x32xf32>
    %cst = arith.constant dense<0.000000e+00> : vector<8x32xf32>
    %5 = tpu.matmul %1, %4, %cst {dimension_numbers = #tpu.dot_dimension_numbers<[1], [0], [0], [1], [0, 0, 1, 1], [], []>} : vector<8x32xf32>, vector<32x32xf32>, vector<8x32xf32> -> vector<8x32xf32>
    %c0_7 = arith.constant 0 : index
    %c0_8 = arith.constant 0 : index
    %6 = vector.load %arg5[%c0_7, %c0_8] : memref<1x32xf32, #tpu.memory_space<vmem>>, vector<1x32xf32>
    %7 = vector.broadcast %6 : vector<1x32xf32> to vector<8x32xf32>
    %8 = arith.addf %5, %7 : vector<8x32xf32>
    %c0_9 = arith.constant 0 : index
    %c0_10 = arith.constant 0 : index
    %9 = vector.load %arg6[%c0_9, %c0_10] : memref<32x64xf32, #tpu.memory_space<vmem>>, vector<32x64xf32>
    %cst_11 = arith.constant dense<0.000000e+00> : vector<16x64xf32>
    %10 = tpu.matmul %3, %9, %cst_11 {dimension_numbers = #tpu.dot_dimension_numbers<[1], [0], [0], [1], [0, 0, 1, 1], [], []>} : vector<16x32xf32>, vector<32x64xf32>, vector<16x64xf32> -> vector<16x64xf32>
    %c0_12 = arith.constant 0 : index
    %c0_13 = arith.constant 0 : index
    %11 = vector.load %arg7[%c0_12, %c0_13] : memref<1x64xf32, #tpu.memory_space<vmem>>, vector<1x64xf32>
    %12 = vector.broadcast %11 : vector<1x64xf32> to vector<16x64xf32>
    %13 = arith.addf %10, %12 : vector<16x64xf32>
    %c0_14 = arith.constant 0 : index
    %c0_15 = arith.constant 0 : index
    %c0_16 = arith.constant 0 : index
    %14 = vector.load %arg3[%c0_14, %c0_15, %c0_16] : memref<1x1x16xi32, #tpu.memory_space<vmem>>, vector<1x1x16xi32>
    %15 = vector.shape_cast %14 : vector<1x1x16xi32> to vector<1x16xi32>
    %c0_i32 = arith.constant 0 : i32
    %16 = vector.broadcast %c0_i32 : i32 to vector<1x16xi32>
    %17 = arith.cmpi sgt, %15, %16 : vector<1x16xi32>
    %18 = tpu.iota {dimensions = array<i32: 0>} : vector<8x16xi32>
    %19 = tpu.iota {dimensions = array<i32: 1>} : vector<8x16xi32>
    %20 = arith.cmpi sgt, %19, %18 : vector<8x16xi32>
    %21 = vector.broadcast %17 : vector<1x16xi1> to vector<8x16xi1>
    %22 = arith.ori %21, %20 : vector<8x16xi1>
    %cst_17 = arith.constant -1.000000e+30 : f32
    %cst_18 = arith.constant 0.000000e+00 : f32
    %23 = vector.broadcast %cst_17 : f32 to vector<8x16xf32>
    %24 = vector.broadcast %cst_18 : f32 to vector<8x16xf32>
    %25 = arith.select %22, %23, %24 : vector<8x16xi1>, vector<8x16xf32>
    %cst_19 = arith.constant 0.000000e+00 : f32
    %26 = vector.broadcast %cst_19 : f32 to vector<8x32xf32>
    %27 = vector.extract_strided_slice %8 {offsets = [0, 0], sizes = [8, 8], strides = [1, 1]} : vector<8x32xf32> to vector<8x8xf32>
    %28 = vector.extract_strided_slice %13 {offsets = [0, 0], sizes = [16, 8], strides = [1, 1]} : vector<16x64xf32> to vector<16x8xf32>
    %29 = vector.extract_strided_slice %13 {offsets = [0, 32], sizes = [16, 8], strides = [1, 1]} : vector<16x64xf32> to vector<16x8xf32>
    %cst_20 = arith.constant dense<0.000000e+00> : vector<8x16xf32>
    %30 = tpu.matmul %27, %28, %cst_20 {dimension_numbers = #tpu.dot_dimension_numbers<[1], [1], [0], [0], [0, 0, 1, 0], [], []>} : vector<8x8xf32>, vector<16x8xf32>, vector<8x16xf32> -> vector<8x16xf32>
    %31 = arith.addf %30, %25 : vector<8x16xf32>
    %cst_21 = arith.constant dense<0xFF800000> : vector<8xf32>
    %32 = vector.multi_reduction <maximumf>, %31, %cst_21 [1] : vector<8x16xf32> to vector<8xf32>
    %33 = vector.shape_cast %32 : vector<8xf32> to vector<8x1xf32>
    %34 = vector.broadcast %33 : vector<8x1xf32> to vector<8x16xf32>
    %35 = arith.subf %31, %34 : vector<8x16xf32>
    %36 = math.exp %35 : vector<8x16xf32>
    %cst_22 = arith.constant dense<0.000000e+00> : vector<8xf32>
    %37 = vector.multi_reduction <add>, %36, %cst_22 [1] : vector<8x16xf32> to vector<8xf32>
    %38 = vector.shape_cast %37 : vector<8xf32> to vector<8x1xf32>
    %39 = tpu.reciprocal %38 {approx = true} : vector<8x1xf32> -> vector<8x1xf32>
    %40 = vector.broadcast %39 : vector<8x1xf32> to vector<8x16xf32>
    %41 = arith.mulf %36, %40 : vector<8x16xf32>
    %cst_23 = arith.constant dense<0.000000e+00> : vector<8x8xf32>
    %42 = tpu.matmul %41, %29, %cst_23 {dimension_numbers = #tpu.dot_dimension_numbers<[1], [0], [0], [1], [0, 0, 1, 1], [], []>} : vector<8x16xf32>, vector<16x8xf32>, vector<8x8xf32> -> vector<8x8xf32>
    %c0_24 = arith.constant 0 : index
    %c0_25 = arith.constant 0 : index
    %43 = vector.load %arg8[%c0_24, %c0_25] : memref<32x32xf32, #tpu.memory_space<vmem>>, vector<8x32xf32>
    %cst_26 = arith.constant dense<0.000000e+00> : vector<8x32xf32>
    %44 = tpu.matmul %42, %43, %cst_26 {dimension_numbers = #tpu.dot_dimension_numbers<[1], [0], [0], [1], [0, 0, 1, 1], [], []>} : vector<8x8xf32>, vector<8x32xf32>, vector<8x32xf32> -> vector<8x32xf32>
    %45 = arith.addf %26, %44 : vector<8x32xf32>
    %46 = vector.extract_strided_slice %8 {offsets = [0, 8], sizes = [8, 8], strides = [1, 1]} : vector<8x32xf32> to vector<8x8xf32>
    %47 = vector.extract_strided_slice %13 {offsets = [0, 8], sizes = [16, 8], strides = [1, 1]} : vector<16x64xf32> to vector<16x8xf32>
    %48 = vector.extract_strided_slice %13 {offsets = [0, 40], sizes = [16, 8], strides = [1, 1]} : vector<16x64xf32> to vector<16x8xf32>
    %cst_27 = arith.constant dense<0.000000e+00> : vector<8x16xf32>
    %49 = tpu.matmul %46, %47, %cst_27 {dimension_numbers = #tpu.dot_dimension_numbers<[1], [1], [0], [0], [0, 0, 1, 0], [], []>} : vector<8x8xf32>, vector<16x8xf32>, vector<8x16xf32> -> vector<8x16xf32>
    %50 = arith.addf %49, %25 : vector<8x16xf32>
    %cst_28 = arith.constant dense<0xFF800000> : vector<8xf32>
    %51 = vector.multi_reduction <maximumf>, %50, %cst_28 [1] : vector<8x16xf32> to vector<8xf32>
    %52 = vector.shape_cast %51 : vector<8xf32> to vector<8x1xf32>
    %53 = vector.broadcast %52 : vector<8x1xf32> to vector<8x16xf32>
    %54 = arith.subf %50, %53 : vector<8x16xf32>
    %55 = math.exp %54 : vector<8x16xf32>
    %cst_29 = arith.constant dense<0.000000e+00> : vector<8xf32>
    %56 = vector.multi_reduction <add>, %55, %cst_29 [1] : vector<8x16xf32> to vector<8xf32>
    %57 = vector.shape_cast %56 : vector<8xf32> to vector<8x1xf32>
    %58 = tpu.reciprocal %57 {approx = true} : vector<8x1xf32> -> vector<8x1xf32>
    %59 = vector.broadcast %58 : vector<8x1xf32> to vector<8x16xf32>
    %60 = arith.mulf %55, %59 : vector<8x16xf32>
    %cst_30 = arith.constant dense<0.000000e+00> : vector<8x8xf32>
    %61 = tpu.matmul %60, %48, %cst_30 {dimension_numbers = #tpu.dot_dimension_numbers<[1], [0], [0], [1], [0, 0, 1, 1], [], []>} : vector<8x16xf32>, vector<16x8xf32>, vector<8x8xf32> -> vector<8x8xf32>
    %c8 = arith.constant 8 : index
    %c0_31 = arith.constant 0 : index
    %62 = vector.load %arg8[%c8, %c0_31] : memref<32x32xf32, #tpu.memory_space<vmem>>, vector<8x32xf32>
    %cst_32 = arith.constant dense<0.000000e+00> : vector<8x32xf32>
    %63 = tpu.matmul %61, %62, %cst_32 {dimension_numbers = #tpu.dot_dimension_numbers<[1], [0], [0], [1], [0, 0, 1, 1], [], []>} : vector<8x8xf32>, vector<8x32xf32>, vector<8x32xf32> -> vector<8x32xf32>
    %64 = arith.addf %45, %63 : vector<8x32xf32>
    %65 = vector.extract_strided_slice %8 {offsets = [0, 16], sizes = [8, 8], strides = [1, 1]} : vector<8x32xf32> to vector<8x8xf32>
    %66 = vector.extract_strided_slice %13 {offsets = [0, 16], sizes = [16, 8], strides = [1, 1]} : vector<16x64xf32> to vector<16x8xf32>
    %67 = vector.extract_strided_slice %13 {offsets = [0, 48], sizes = [16, 8], strides = [1, 1]} : vector<16x64xf32> to vector<16x8xf32>
    %cst_33 = arith.constant dense<0.000000e+00> : vector<8x16xf32>
    %68 = tpu.matmul %65, %66, %cst_33 {dimension_numbers = #tpu.dot_dimension_numbers<[1], [1], [0], [0], [0, 0, 1, 0], [], []>} : vector<8x8xf32>, vector<16x8xf32>, vector<8x16xf32> -> vector<8x16xf32>
    %69 = arith.addf %68, %25 : vector<8x16xf32>
    %cst_34 = arith.constant dense<0xFF800000> : vector<8xf32>
    %70 = vector.multi_reduction <maximumf>, %69, %cst_34 [1] : vector<8x16xf32> to vector<8xf32>
    %71 = vector.shape_cast %70 : vector<8xf32> to vector<8x1xf32>
    %72 = vector.broadcast %71 : vector<8x1xf32> to vector<8x16xf32>
    %73 = arith.subf %69, %72 : vector<8x16xf32>
    %74 = math.exp %73 : vector<8x16xf32>
    %cst_35 = arith.constant dense<0.000000e+00> : vector<8xf32>
    %75 = vector.multi_reduction <add>, %74, %cst_35 [1] : vector<8x16xf32> to vector<8xf32>
    %76 = vector.shape_cast %75 : vector<8xf32> to vector<8x1xf32>
    %77 = tpu.reciprocal %76 {approx = true} : vector<8x1xf32> -> vector<8x1xf32>
    %78 = vector.broadcast %77 : vector<8x1xf32> to vector<8x16xf32>
    %79 = arith.mulf %74, %78 : vector<8x16xf32>
    %cst_36 = arith.constant dense<0.000000e+00> : vector<8x8xf32>
    %80 = tpu.matmul %79, %67, %cst_36 {dimension_numbers = #tpu.dot_dimension_numbers<[1], [0], [0], [1], [0, 0, 1, 1], [], []>} : vector<8x16xf32>, vector<16x8xf32>, vector<8x8xf32> -> vector<8x8xf32>
    %c16 = arith.constant 16 : index
    %c0_37 = arith.constant 0 : index
    %81 = vector.load %arg8[%c16, %c0_37] : memref<32x32xf32, #tpu.memory_space<vmem>>, vector<8x32xf32>
    %cst_38 = arith.constant dense<0.000000e+00> : vector<8x32xf32>
    %82 = tpu.matmul %80, %81, %cst_38 {dimension_numbers = #tpu.dot_dimension_numbers<[1], [0], [0], [1], [0, 0, 1, 1], [], []>} : vector<8x8xf32>, vector<8x32xf32>, vector<8x32xf32> -> vector<8x32xf32>
    %83 = arith.addf %64, %82 : vector<8x32xf32>
    %84 = vector.extract_strided_slice %8 {offsets = [0, 24], sizes = [8, 8], strides = [1, 1]} : vector<8x32xf32> to vector<8x8xf32>
    %85 = vector.extract_strided_slice %13 {offsets = [0, 24], sizes = [16, 8], strides = [1, 1]} : vector<16x64xf32> to vector<16x8xf32>
    %86 = vector.extract_strided_slice %13 {offsets = [0, 56], sizes = [16, 8], strides = [1, 1]} : vector<16x64xf32> to vector<16x8xf32>
    %cst_39 = arith.constant dense<0.000000e+00> : vector<8x16xf32>
    %87 = tpu.matmul %84, %85, %cst_39 {dimension_numbers = #tpu.dot_dimension_numbers<[1], [1], [0], [0], [0, 0, 1, 0], [], []>} : vector<8x8xf32>, vector<16x8xf32>, vector<8x16xf32> -> vector<8x16xf32>
    %88 = arith.addf %87, %25 : vector<8x16xf32>
    %cst_40 = arith.constant dense<0xFF800000> : vector<8xf32>
    %89 = vector.multi_reduction <maximumf>, %88, %cst_40 [1] : vector<8x16xf32> to vector<8xf32>
    %90 = vector.shape_cast %89 : vector<8xf32> to vector<8x1xf32>
    %91 = vector.broadcast %90 : vector<8x1xf32> to vector<8x16xf32>
    %92 = arith.subf %88, %91 : vector<8x16xf32>
    %93 = math.exp %92 : vector<8x16xf32>
    %cst_41 = arith.constant dense<0.000000e+00> : vector<8xf32>
    %94 = vector.multi_reduction <add>, %93, %cst_41 [1] : vector<8x16xf32> to vector<8xf32>
    %95 = vector.shape_cast %94 : vector<8xf32> to vector<8x1xf32>
    %96 = tpu.reciprocal %95 {approx = true} : vector<8x1xf32> -> vector<8x1xf32>
    %97 = vector.broadcast %96 : vector<8x1xf32> to vector<8x16xf32>
    %98 = arith.mulf %93, %97 : vector<8x16xf32>
    %cst_42 = arith.constant dense<0.000000e+00> : vector<8x8xf32>
    %99 = tpu.matmul %98, %86, %cst_42 {dimension_numbers = #tpu.dot_dimension_numbers<[1], [0], [0], [1], [0, 0, 1, 1], [], []>} : vector<8x16xf32>, vector<16x8xf32>, vector<8x8xf32> -> vector<8x8xf32>
    %c24 = arith.constant 24 : index
    %c0_43 = arith.constant 0 : index
    %100 = vector.load %arg8[%c24, %c0_43] : memref<32x32xf32, #tpu.memory_space<vmem>>, vector<8x32xf32>
    %cst_44 = arith.constant dense<0.000000e+00> : vector<8x32xf32>
    %101 = tpu.matmul %99, %100, %cst_44 {dimension_numbers = #tpu.dot_dimension_numbers<[1], [0], [0], [1], [0, 0, 1, 1], [], []>} : vector<8x8xf32>, vector<8x32xf32>, vector<8x32xf32> -> vector<8x32xf32>
    %102 = arith.addf %83, %101 : vector<8x32xf32>
    %c0_45 = arith.constant 0 : index
    %c0_46 = arith.constant 0 : index
    %103 = vector.load %arg9[%c0_45, %c0_46] : memref<1x32xf32, #tpu.memory_space<vmem>>, vector<1x32xf32>
    %104 = vector.broadcast %103 : vector<1x32xf32> to vector<8x32xf32>
    %105 = arith.addf %102, %104 : vector<8x32xf32>
    %c0_47 = arith.constant 0 : index
    %c0_48 = arith.constant 0 : index
    %c0_49 = arith.constant 0 : index
    %106 = vector.load %arg10[%c0_47, %c0_48, %c0_49] : memref<1x8x32xf32, #tpu.memory_space<vmem>>, vector<1x8x32xf32>
    %107 = vector.shape_cast %106 : vector<1x8x32xf32> to vector<8x32xf32>
    %108 = vector.shape_cast %105 : vector<8x32xf32> to vector<1x8x32xf32>
    tpu.vector_store %arg10[%c0_47, %c0_48, %c0_49], %108 {strides = array<i32>} : memref<1x8x32xf32, #tpu.memory_space<vmem>>, vector<1x8x32xf32>,
    return
  }
  func.func @transform_0(%arg0: i32) -> (i32, i32, i32) {
    %c0_i32 = arith.constant 0 : i32
    %c0_i32_0 = arith.constant 0 : i32
    %c0_i32_1 = arith.constant 0 : i32
    return %arg0, %c0_i32, %c0_i32_0 : i32, i32, i32
  }
  func.func @transform_1(%arg0: i32) -> (i32, i32, i32) {
    %c0_i32 = arith.constant 0 : i32
    %c0_i32_0 = arith.constant 0 : i32
    %c0_i32_1 = arith.constant 0 : i32
    return %arg0, %c0_i32, %c0_i32_0 : i32, i32, i32
  }
  func.func @transform_2(%arg0: i32) -> (i32, i32, i32) {
    %c0_i32 = arith.constant 0 : i32
    %c0_i32_0 = arith.constant 0 : i32
    %c0_i32_1 = arith.constant 0 : i32
    return %arg0, %c0_i32, %c0_i32_0 : i32, i32, i32
  }
  func.func @transform_3(%arg0: i32) -> (i32, i32) {
    %c0_i32 = arith.constant 0 : i32
    %c0_i32_0 = arith.constant 0 : i32
    %c0_i32_1 = arith.constant 0 : i32
    return %c0_i32, %c0_i32_0 : i32, i32
  }
  func.func @transform_4(%arg0: i32) -> (i32, i32) {
    %c0_i32 = arith.constant 0 : i32
    %c0_i32_0 = arith.constant 0 : i32
    %c0_i32_1 = arith.constant 0 : i32
    return %c0_i32, %c0_i32_0 : i32, i32
  }
  func.func @transform_5(%arg0: i32) -> (i32, i32) {
    %c0_i32 = arith.constant 0 : i32
    %c0_i32_0 = arith.constant 0 : i32
    %c0_i32_1 = arith.constant 0 : i32
    return %c0_i32, %c0_i32_0 : i32, i32
  }
  func.func @transform_6(%arg0: i32) -> (i32, i32) {
    %c0_i32 = arith.constant 0 : i32
    %c0_i32_0 = arith.constant 0 : i32
    %c0_i32_1 = arith.constant 0 : i32
    return %c0_i32, %c0_i32_0 : i32, i32
  }
  func.func @transform_7(%arg0: i32) -> (i32, i32) {
    %c0_i32 = arith.constant 0 : i32
    %c0_i32_0 = arith.constant 0 : i32
    %c0_i32_1 = arith.constant 0 : i32
    return %c0_i32, %c0_i32_0 : i32, i32
  }
  func.func @transform_8(%arg0: i32) -> (i32, i32) {
    %c0_i32 = arith.constant 0 : i32
    %c0_i32_0 = arith.constant 0 : i32
    %c0_i32_1 = arith.constant 0 : i32
    return %c0_i32, %c0_i32_0 : i32, i32
  }
  func.func @transform_9(%arg0: i32) -> (i32, i32, i32) {
    %c0_i32 = arith.constant 0 : i32
    %c0_i32_0 = arith.constant 0 : i32
    %c0_i32_1 = arith.constant 0 : i32
    return %arg0, %c0_i32, %c0_i32_0 : i32, i32, i32
  }
}

</mosaic_0001>

<bundles_post_ra>
// kernel: tpu_custom_call.1
= control target key start
LH: loop header
LB: loop body
LE: loop exit
PB: predicated region body
PF: predicated region fallthrough
CT: control target
= control target key end

     0   :  { %s2740_s0 = inlined_call_operand.hbm [shape: f32[2,8,32], index: 0, kind: input, shape index: {}]   ;;  %s2741_s1 = inlined_call_operand.hbm [shape: f32[2,16,32], index: 1, kind: input, shape index: {}]   ;;  %s2742_s2 = inlined_call_operand.vmem [shape: s32[2,1,16], index: 2, kind: input, shape index: {}]   ;;  %s2743_s3 = inlined_call_operand.hbm [shape: f32[32,32], index: 3, kind: input, shape index: {}]   ;;  %s2744_s4 = inlined_call_operand.vmem [shape: f32[1,32], index: 4, kind: input, shape index: {}]   ;;  %s2745_s5 = inlined_call_operand.hbm [shape: f32[32,64], index: 5, kind: input, shape index: {}]   ;;  %s2746_s6 = inlined_call_operand.vmem [shape: f32[1,64], index: 6, kind: input, shape index: {}]   ;;  %s2747_s7 = inlined_call_operand.hbm [shape: f32[32,32], index: 7, kind: input, shape index: {}]   ;;  %s2748_s8 = inlined_call_operand.vmem [shape: f32[1,32], index: 8, kind: input, shape index: {}]   ;;  %s2749_s9 = inlined_call_operand.hbm [shape: f32[2,8,32], index: 9, kind: output, shape index: {}]  }
   0x1   :  { %2756 = sst [smem:[#allocation18_spill]] %s2743_s3 }
   0x2   :  { %2757 = sst [smem:[#allocation19_spill]] %s2745_s5 }
   0x3   :  { %2758 = sst [smem:[#allocation20_spill]] %s2747_s7 }
   0x4   :  { %14 = vsyncpa [#allocation3], 0 }
   0x5   :  { %16 = vsyncpa [#allocation3 + $0x1], 0 }
   0x6   :  { %17 = vsyncpa [#allocation6], 0 }
   0x7   :  { %19 = vsyncpa [#allocation6 + $0x1], 0 }
   0x8   :  { %20 = vsyncpa [#allocation9], 0 }
   0x9   :  { %21 = vsyncpa [#allocation4], 0 }
   0xa   :  { %23 = vsyncpa [#allocation4 + $0x1], 0  ;;  %s2358_s30 = smov 0   ;;  %s2360_s10 = smov 0  }
   0xb   :  { %s2362_s11 = smov 0   ;;  %s2364_s12 = smov 0  }
   0xc LB: > { %s2379_s13 = sadd.s32 4294967295, %s2288_s12   ;;  %s1778_s14 = sadd.s32 4294967294, %s2288_s12   ;;  %s2288_s12 = sphi %s2364_s12, %s2784_s12   ;;  %s2284_s11 = sphi %s2362_s11, %s2783_s11   ;;  %s2280_s10 = sphi %s2360_s10, %s2782_s10   ;;  %s2276_s30 = sphi %s2358_s30, %s2781_s30  }
   0xd   : > { %p49_p0 = scmp.ne.s32.totalorder %s2280_s10, %s2276_s30  ;;  %p2750_p1 = scmp.eq.s32.totalorder %s2379_s13, 0 }
   0xe   : > { %p251_p2 = scmp.eq.s32.totalorder %s2379_s13, 1  ;;  %p257_p3 = scmp.eq.s32.totalorder %s1778_s14, 1 }
   0xf   : > { %p2388_p4 = por %p2750_p1, %p49_p0  ;;  %p1779_p5 = scmp.ge.s32.totalorder %s2288_s12, 1 }
  0x10   : > { %p2393_p6 = por %p257_p3, %p49_p0  ;;  %p264_p7 = scmp.lt.s32.totalorder %s2288_s12, 3 }
  0x11   : > { %s2759_s15 = scalar_select %p2388_p4, 1, 0 }
  0x12   : > { %s2760_s16 = scalar_select %p2393_p6, 1, 0 }
  0x13   : > { %p2398_p8 = pnand %p1779_p5, %p264_p7  ;;  %s2290_s18 = smov [#allocation7]  }
  0x14   : > { %s276_s19 = sshll.u32 %s2290_s18, 4  ;;  %s2291_s21 = smov [#allocation8]   ;;  %s277_s19 = int_to_ptr.vmem [resolvable:$true] %s276_s19 }
  0x15   : > { %s2761_s17 = scalar_select %p2398_p8, 1, 0 }
  0x16   : > { %p1986_p9 = pneg %p2398_p8  ;;  %s292_s22 = sshll.u32 %s2291_s21, 4  ;;  %s293_s22 = int_to_ptr.vmem [resolvable:$true] %s292_s22 }
  0x17   : > { %s2292_s23 = smov [#allocation10]   ;;  %s2089_s25 = scalar_lea.vmem %s277_s19, 512 }
  0x18   : > { %p2407_p11 = pnand %p1986_p9, %p2750_p1  ;;  %s308_s24 = sshll.u32 %s2292_s23, 4  ;;  %s309_s24 = int_to_ptr.vmem [resolvable:$true] %s308_s24 }
  0x19   : > { %p2090_p13 = scmp.ne.s32.totalorder %s277_s19, %s2089_s25  ;;  %p2097_p5 = scmp.lt.s32.totalorder %s277_s19, %s277_s19 }
  0x1a   : > { %p2080_p12 = pneg %p2407_p11  ;;  %p2098_p7 = scmp.lt.s32.totalorder %s2089_s25, %s2089_s25 }
  0x1c   : > { %p2092_p0 = pnand %p2090_p13, %p2080_p12  ;;  %p2099_p9 = por %p2098_p7, %p2097_p5 }
  0x1e   : > { %p2093_p3 = pneg %p2092_p0 }
  0x20   : > { %p2100_p10 = pnand %p2099_p9, %p2093_p3 }
  0x22   : > { %2103 = shalt.err (!%p2100_p10)
}
  0x23   : > { %s2751_s26 = smov 128   ;;  %s2752_s27 = smov 8  }
  0x24   : > { %s2763_s3 = sld [smem:[#allocation18_spill]]  ;;  %s2115_s14 = scalar_lea.vmem %s293_s22, 512 }
  0x25   : > { %p2116_p13 = scmp.ne.s32.totalorder %s293_s22, %s2115_s14  ;;  %p2123_p3 = scmp.lt.s32.totalorder %s293_s22, %s293_s22 }
  0x26   : > { %p2124_p10 = scmp.lt.s32.totalorder %s2115_s14, %s2115_s14 }
  0x27   : > { %p2118_p0 = pnand %p2116_p13, %p2080_p12 }
  0x28   : > { %p2125_p7 = por %p2124_p10, %p2123_p3 }
  0x29   : > { %p2119_p5 = pneg %p2118_p0 }
  0x2a   : > { %1989 = dma.hbm_to_vmem [thread:$0]  (!%p2407_p11), %s2763_s3, 512, %s277_s19, [#allocation6], %s2751_s26, %s2751_s26, %s2752_s27  }
  0x2b   : > { %p2126_p9 = pnand %p2125_p7, %p2119_p5 }
  0x2d   : > { %2129 = shalt.err (!%p2126_p9)
}
  0x2e   : > { %s2764_s5 = sld [smem:[#allocation19_spill]]  ;;  %s2141_s19 = scalar_lea.vmem %s309_s24, 512 }
  0x2f   : > { %p2142_p1 = scmp.ne.s32.totalorder %s309_s24, %s2141_s19  ;;  %p2149_p3 = scmp.lt.s32.totalorder %s309_s24, %s309_s24 }
  0x30   : > { %p2150_p5 = scmp.lt.s32.totalorder %s2141_s19, %s2141_s19 }
  0x31   : > { %p2144_p13 = pnand %p2142_p1, %p2080_p12 }
  0x32   : > { %p2151_p10 = por %p2150_p5, %p2149_p3 }
  0x33   : > { %p2145_p0 = pneg %p2144_p13 }
  0x34   : > { %1992 = dma.hbm_to_vmem [thread:$0]  (!%p2407_p11), %s2764_s5, 512, %s293_s22, [#allocation9], %s2751_s26, %s2751_s26, %s2752_s27  }
  0x35   : > { %p2152_p7 = pnand %p2151_p10, %p2145_p0 }
  0x37   : > { %2155 = shalt.err (!%p2152_p7)
}
  0x38   : > { %s2765_s7 = sld [smem:[#allocation20_spill]]  ;;  %s2447_s22 = sadd.s32 1, %s2288_s12  }
  0x39   : > { %s33_s20 = ssub.s32 %s2288_s12, %s2447_s22  ;;  %s36_s28 = sadd.s32 1, %s2284_s11 }
  0x3a   : > { %p34_p1 = scmp.eq.s32.totalorder %s33_s20, 0  ;;  %p43_p12 = scmp.ne.s32.totalorder %s2284_s11, %s2280_s10 }
  0x3b   : > { %p44_p9 = scmp.eq.s32.totalorder %s2288_s12, 0  ;;  %p2010_p13 = scmp.lt.s32.totalorder %s2288_s12, 2 }
  0x3c   : > { %s2457_s29 = scalar_select %p34_p1, %s2284_s11, %s36_s28  }
  0x3d   : > { %p45_p0 = por %p44_p9, %p43_p12  ;;  %p2461_p3 = por %p251_p2, %p43_p12 }
  0x3e   : > { %1995 = dma.hbm_to_vmem [thread:$0]  (!%p2407_p11), %s2765_s7, 512, %s309_s24, [#allocation9], %s2751_s26, %s2751_s26, %s2752_s27  }
  0x3f   : > { %2766 = sst [smem:[#allocation17_spill]] %s2457_s29  ;;  %s2466_s18 = sand.u32 1, %s2284_s11  }
  0x40   : > { %s2767_s14 = scalar_select %p2461_p3, 1, 0 }
  0x41   : > { %s1785_s24 = sshll.u32 %s2288_s12, 7  ;;  %s1784_s21 = sshll.u32 %s2466_s18, 3 }
  0x42   : > { %s2473_s25 = scalar_lea.hbm %s2740_s0, %s1785_s24  ;;  %s329_s20 = scalar_lea.vmem [#allocation2], %s1784_s21 }
  0x43   : > { %s336_s28 = sshll.u32 %s329_s20, 4  ;;  %p2475_p2 = pnand %p2010_p13, %p45_p0  ;;  %s337_s28 = int_to_ptr.vmem [resolvable:$true] %s336_s28 }
  0x44   : > { %s1786_s27 = sshll.u32 %s2466_s18, 4  ;;  %s326_s3 = scalar_lea.sflag [#allocation3], %s2466_s18 }
  0x45   : > { %s2156_s5 = scalar_lea.hbm %s2473_s25, 128  ;;  %p2158_p5 = pneg %p2475_p2 }
  0x46   : > { %p2157_p11 = scmp.ne.s32.totalorder %s2473_s25, %s2156_s5  ;;  %s2161_s19 = scalar_lea.hbm %s2740_s0, 256 }
  0x47   : > { %p2162_p1 = scmp.lt.s32.totalorder %s2473_s25, %s2740_s0  ;;  %p2163_p12 = scmp.lt.s32.totalorder %s2161_s19, %s2156_s5 }
  0x48   : > { %p2159_p10 = pnand %p2158_p5, %p2157_p11 }
  0x49   : > { %p2164_p9 = por %p2163_p12, %p2162_p1 }
  0x4a   : > { %p2160_p7 = pneg %p2159_p10 }
  0x4c   : > { %p2165_p13 = pnand %p2164_p9, %p2160_p7 }
  0x4e   : > { %2168 = shalt.err (!%p2165_p13)
}
  0x4f   : > { %s2169_s18 = scalar_lea.vmem %s337_s28, 128  ;;  %s2295_s7 = smov [#allocation2]  }
  0x50   : > { %p2170_p0 = scmp.ne.s32.totalorder %s337_s28, %s2169_s18  ;;  %s2174_s29 = sshll.u32 %s2295_s7, 4  ;;  %s2175_s29 = int_to_ptr.vmem [resolvable:$false] %s2174_s29 }
  0x51   : > { %s2176_s24 = scalar_lea.vmem %s2175_s29, 256  ;;  %p2177_p10 = scmp.lt.s32.totalorder %s337_s28, %s2175_s29 }
  0x52   : > { %p2172_p6 = pnand %p2170_p0, %p2158_p5  ;;  %p2178_p3 = scmp.lt.s32.totalorder %s2176_s24, %s2169_s18 }
  0x54   : > { %p2173_p11 = pneg %p2172_p6  ;;  %p2179_p4 = por %p2178_p3, %p2177_p10 }
  0x56   : > { %p2180_p8 = pnand %p2179_p4, %p2173_p11 }
  0x58   : > { %2183 = shalt.err (!%p2180_p8)
}
  0x59   : > { %1999 = dma.hbm_to_vmem [thread:$0]  (!%p2475_p2), %s2473_s25, 128, %s337_s28, %s326_s3  }
  0x5a   : > { %s347_s5 = scalar_lea.vmem [#allocation5], %s1786_s27  ;;  %s343_s19 = sand.u32 1, %s2288_s12  }
  0x5b   : > { %s354_s21 = sshll.u32 %s347_s5, 4  ;;  %s1826_s7 = sshll.u32 %s2288_s12, 8  ;;  %s2502_s21 = int_to_ptr.vmem [resolvable:$true] %s354_s21 }
  0x5c   : > { %s2508_s29 = scalar_lea.hbm %s2741_s1, %s1826_s7  ;;  %s344_s18 = scalar_lea.sflag [#allocation6], %s343_s19 }
  0x5d   : > { %s2184_s24 = scalar_lea.hbm %s2508_s29, 256  ;;  %s2189_s25 = scalar_lea.hbm %s2741_s1, 512 }
  0x5e   : > { %p2185_p4 = scmp.ne.s32.totalorder %s2508_s29, %s2184_s24  ;;  %p2190_p3 = scmp.lt.s32.totalorder %s2508_s29, %s2741_s1 }
  0x5f   : > { %p2191_p7 = scmp.lt.s32.totalorder %s2189_s25, %s2184_s24 }
  0x60   : > { %p2187_p6 = pnand %p2185_p4, %p2158_p5 }
  0x61   : > { %p2192_p1 = por %p2191_p7, %p2190_p3 }
  0x62   : > { %p2188_p8 = pneg %p2187_p6 }
  0x64   : > { %p2193_p12 = pnand %p2192_p1, %p2188_p8 }
  0x66   : > { %2196 = shalt.err (!%p2193_p12)
}
  0x67   : > { %s2197_s19 = scalar_lea.vmem %s2502_s21, 256  ;;  %s2296_s7 = smov [#allocation5]  }
  0x68   : > { %p2198_p9 = scmp.ne.s32.totalorder %s2502_s21, %s2197_s19  ;;  %s2202_s23 = sshll.u32 %s2296_s7, 4  ;;  %s2203_s23 = int_to_ptr.vmem [resolvable:$false] %s2202_s23 }
  0x69   : > { %s2204_s20 = scalar_lea.vmem %s2203_s23, 512  ;;  %p2205_p11 = scmp.lt.s32.totalorder %s2502_s21, %s2203_s23 }
  0x6a   : > { %p2200_p13 = pnand %p2198_p9, %p2158_p5  ;;  %p2206_p10 = scmp.lt.s32.totalorder %s2204_s20, %s2197_s19 }
  0x6c   : > { %p2201_p0 = pneg %p2200_p13  ;;  %p2207_p4 = por %p2206_p10, %p2205_p11 }
  0x6e   : > { %p2208_p6 = pnand %p2207_p4, %p2201_p0 }
  0x70   : > { %2211 = shalt.err (!%p2208_p6)
}
  0x71   : > { %s2769_s24 = smov 8   ;;  %s2770_s3 = smov 128  }
  0x72   : > { %2002 = dma.hbm_to_vmem [thread:$0]  (!%p2475_p2), %s2508_s29, 256, %s2502_s21, %s344_s18, %s2770_s3, %s2770_s3, %s2769_s24  }
  0x73   : > { %p2771_p5 = scmp.ne.s32.totalorder %s2761_s17, 0 }
  0x74   : > { %s2538_s27 = sand.u32 (!%p2771_p5), 1, %s2280_s10   ;;  %p2772_p8 = scmp.ne.s32.totalorder (!%p2771_p5), %s2759_s15, 0 }
  0x75   : > { %372 = sbr.rel (%p2771_p5) target bundleno = 2674 (0xa72), region = 56  ;;  %s1790_s25 = sshll.u32 (!%p2771_p5), %s2538_s27, 3 }
  0x76   : > { %s375_s28 = scalar_lea.sflag (!%p2771_p5), [#allocation3], %s2538_s27  ;;  %s2544_s26 = scalar_lea.vmem (!%p2771_p5), [#allocation2], %s1790_s25 }
  0x7a   : > { %2255 = dma.done.wait (%p2772_p8), %s375_s28, 128  }
  0x7b   : > { %2257 = vsyncadd (%p2772_p8), %s375_s28, 4294967168  ;;  %s383_s17 = sand.u32 1, %s2379_s13   ;;  %s1791_s21 = sshll.u32 %s2538_s27, 4 }
  0x7c   : > { %s384_s29 = scalar_lea.sflag [#allocation6], %s383_s17  ;;  %s387_s18 = scalar_lea.vmem [#allocation5], %s1791_s21 }
  0x7d   : > { %2259 = dma.done.wait (%p2772_p8), %s384_s29, 256  }
  0x7e   : > { %2261 = vsyncadd (%p2772_p8), %s384_s29, 4294967040  ;;  %p2773_p2 = scmp.eq.s32.totalorder %s2379_s13, 0 }
  0x80   : > { %2263 = dma.done.wait (%p2773_p2), [#allocation6], 512   ;;  %p2774_p3 = pmov %p2773_p2 }
  0x81   : > { %p2775_p7 = pmov %p2773_p2 }
  0x82   : > { %2265 = vsyncadd (%p2774_p3), [#allocation6], 4294966784 }
  0x83   : > { %2267 = dma.done.wait (%p2775_p7), [#allocation9], 1024   ;;  %p2776_p1 = pmov %p2773_p2 }
  0x84   : > { %v2297_v0 = vmov 0.0   ;;  %vm2298_vm0 = vmmov 0   ;;  %v536_v1 = vld [vmem:[#allocation8 + $0x18] sm:$0xff]  ;;  %v535_v2 = vld [vmem:[#allocation8 + $0x10] sm:$0xff]  ;;  %vm459_vm1 = vcmask 261120   ;;  %v534_v5 = vld [vmem:[#allocation8 + $0x8] sm:$0xff]  ;;  %v627_v23 = vlaneseq }
  0x85   : > { %2269 = vsyncadd (%p2776_p1), [#allocation9], 4294966272  ;;  %1870 = vmatprep.subr.mxu0 %v2297_v0  ;;  %1878 = vmatprep.mubr.msk.f32.mxu0 %vm2298_vm0, %v2297_v0  ;;  %v451_v3 = vld [vmem:[#allocation7 + $0x18] sm:$0xff]  ;;  %v446_v4 = vld [vmem:[%s387_s18] sm:$0xff]  ;;  %vm640_vm2 = vcmask 64512   ;;  %s2299_s19 = smov 96  }
  0x86   : > { %1881 = vmatprep.subr.mxu1 %v536_v1  ;;  %1871 = vmatpush3.msra.mxu0 %v451_v3  ;;  %v450_v6 = vld [vmem:[#allocation7 + $0x10] sm:$0xff]  ;;  %v533_v7 = vld [vmem:[#allocation8] sm:$0xff]  ;;  %v449_v8 = vld [vmem:[#allocation7 + $0x8] sm:$0xff]  ;;  %s2300_s20 = smov 120   ;;  %p442_p12 = scmp.lt.s32.totalorder %s2379_s13, 1  ;;  %v628_v25 = vshrl.u32 %v627_v23, 7 }
  0x87   : > { %1882 = vmatpush3.msra.mxu1 %v536_v1  ;;  %1872 = vmatprep.subr.mxu0 %v2297_v0  ;;  %v447_v9 = vld [vmem:[%s387_s18 + $0x8] sm:$0xff]  ;;  %v448_v10 = vld [vmem:[#allocation7] sm:$0xff]  ;;  %v1798_v12 = vld [vmem:[%s2746_s6] ss:$0 sm:$0xff]  ;;  %v2301_v27 = vmov 0   ;;  %v630_v29 = vand.u32 127, %v627_v23 }
  0x88   : > { %1883 = vmatprep.subr.mxu1 %v535_v2  ;;  %1889 = vmatprep.mubr.msk.f32.mxu1 %vm459_vm1, %v446_v4  ;;  %v445_v11 = vld [vmem:[%s2544_s26] sm:$0xff]  ;;  %s443_s24 = scalar_select %p442_p12, %s2379_s13, 1  ;;  %v635_v26 = vsub.s32 0, %v628_v25  ;;  %vm720_vm7 = vcmask 130048   ;;  %v811_v47 = vld [vmem:[#allocation10] sm:$0xff]  ;;  %v984_v3 = vld [vmem:[#allocation10 + $0x8] sm:$0xff] }
  0x89   : > { %1884 = vmatpush3.msra.mxu1 %v535_v2  ;;  %1873 = vmatpush3.msra.mxu0 %v450_v6  ;;  %v1796_v17 = vld [vmem:[%s2744_s4] ss:$0 sm:$0xff]  ;;  %vm631_vm4 = vcmp.gt.s32.totalorder %v630_v29, %v628_v25  ;;  %s2302_s17 = smov 88   ;;  %s2303_s21 = smov 112  }
  0x8a   : > { %1885 = vmatprep.subr.mxu1 %v534_v5  ;;  %1874 = vmatprep.subr.mxu0 %v2297_v0  ;;  %s444_s26 = scalar_lea.vmem %s2742_s2, %s443_s24  ;;  %s2304_s29 = smov 104  }
  0x8b   : > { %1886 = vmatpush3.msra.mxu1 %v534_v5  ;;  %1875 = vmatpush3.msra.mxu0 %v449_v8  ;;  %v625_v24 = vld [vmem:[%s444_s26] sm:$0x1]  ;;  %s2305_s18 = smov 80   ;;  %s2306_s15 = smov 72  }
  0x8c   : > { %1887 = vmatprep.subr.mxu1 %v533_v7  ;;  %1876 = vmatprep.subr.mxu0 %v2297_v0  ;;  %vm626_vm3 = vcmp.gt.s32.totalorder %v625_v24, 0  ;;  %s1823_s7 = sshll.u32 %s2379_s13, 7  ;;  %s441_s23 = scalar_lea.vmem [#allocation11], %s1790_s25 }
  0x8d   : > { %1888 = vmatpush3.msra.mxu1 %v533_v7  ;;  %1877 = vmatpush3.msra.mxu0 %v448_v10  ;;  %v632_v28 = vsel %vm626_vm3, 1, %v2301_v27  ;;  %s1646_s28 = scalar_lea.hbm %s2749_s9, %s1823_s7  ;;  %s1635_s26 = scalar_lea.sflag [#allocation4], %s2538_s27 }
  0x8e   : > { %1890 = vmatmul.mubr.msk.f32.vlgmr.msra.gmra.mxu1 %vm459_vm1, %v447_v9  ;;  %1879 = vmatmul.mubr.msk.f32.vlgmr.msra.gmra.mxu0 %vm459_vm1, %v445_v11  ;;  %v636_v30 = vrot.slane %v632_v28, %v635_v26  ;;  %p2777_p13 = scmp.ne.s32.totalorder %s2767_s14, 0  ;;  %s2307_s13 = smov [#allocation11]  }
  0x8f   : > { %1892 = vmatprep.subr.mxu0 %v2297_v0  ;;  %1896 = vmatprep.mubr.msk.f32.mxu0 %vm2298_vm0, %v2297_v0 }
  0x90   : > { %1899 = vmatprep.subr.mxu1 %v2297_v0  ;;  %1903 = vmatprep.mubr.msk.f32.mxu1 %vm2298_vm0, %v2297_v0  ;;  %vm637_vm5 = vcmp.eq.s32.totalorder %v636_v30, 1 }
  0x91   : > { %vm638_vm6 = vmor %vm637_vm5, %vm631_vm4 }
  0x92   : > { %v2616_v31 = vsel %vm638_vm6, -1e+30, %v2297_v0 }
 0x14e   : > { %v1891_v13 = vpop.f32.mrf.mxu1  ;;  %v529_v15 = vpop.f32.mrf.mxu0 }
 0x14f   : > { %v2583_v14 = vadd.f32 %v1891_v13, %v1798_v12  ;;  %v2594_v20 = vadd.f32 %v1796_v17, %v529_v15 }
 0x150   : > { %v616_v16 = vpop.f32.mrf.mxu1  ;;  %v1880_v18 = vpop.f32.mrf.mxu0 }
 0x151   : > { %734 = vrot.lane.b32.xlu1 %v2583_v14, %s2299_s19  ;;  %1893 = vmatpush3.xpose.msk.msra.mxu0 %vm640_vm2, %v2583_v14  ;;  %v2592_v19 = vadd.f32 %v1798_v12, %v616_v16 }
 0x152   : > { %1894 = vmatprep.subr.mxu0 %v2297_v0 }
 0x155   : > { %732 = vrot.lane.b32.xlu1 %v2592_v19, %s2299_s19  ;;  %1895 = vmatpush3.xpose.msk.msra.mxu0 %vm640_vm2, %v2592_v19 }
 0x156   : > { %1913 = vmatprep.subr.mxu0 %v2297_v0 }
 0x158   : > { %1897 = vmatmul.mubr.msk.f32.vlgmr.msra.gmra.mxu0 %vm640_vm2, %v2594_v20 }
 0x159   : > { %814 = vrot.lane.b32.xlu1 %v2592_v19, %s2300_s20  ;;  %1917 = vmatprep.mubr.msk.f32.mxu0 %vm2298_vm0, %v2297_v0 }
 0x15d   : > { %812 = vrot.lane.b32.xlu1 %v2594_v20, %s2300_s20 }
 0x1c3   : > { %v735_v21 = vpop.permute.xlu1 %734 }
 0x1c4   : > { %1900 = vmatpush3.msra.mxu1 %v735_v21 }
 0x1c5   : > { %1901 = vmatprep.subr.mxu1 %v2297_v0 }
 0x1c7   : > { %v733_v22 = vpop.permute.xlu1 %732 }
 0x1c8   : > { %1902 = vmatpush3.msra.mxu1 %v733_v22 }
 0x1c9   : > { %1906 = vmatprep.subr.mxu1 %v2297_v0 }
 0x1cb   : > { %v815_v45 = vpop.permute.xlu1 %814 }
 0x1cf   : > { %v813_v46 = vpop.permute.xlu1 %812 }
 0x218   : > { %v716_v32 = vpop.f32.mrf.mxu0 }
 0x219   : > { %v717_v33 = vadd.f32 %v716_v32, %v2616_v31 }
 0x21a   : > { %v1898_v34 = vpop.f32.mrf.mxu0 }
 0x21b   : > { %v721_v35 = vsel %vm720_vm7, %v717_v33, -inf }
 0x21c   : > { %722 = vmax.xlane.f32.xlu0 %v721_v35 }
 0x2a5   : > { %v723_v36 = vpop.xlane.xlu0 %722 }
 0x2a6   : > { %v724_v37 = vsub.f32 %v717_v33, %v723_v36 }
 0x2a8   : > { %v725_v38 = vmul.f32 1.442695, %v724_v37 }
 0x2aa   : > { %2062 = vpow2.f32 %v725_v38  ;;  %v1303_v38 = vld [vmem:[#allocation10 + $0x10] sm:$0xff] }
 0x2b7   : > { %v2063_v39 = vpop.eup %2062 }
 0x2b8   : > { %v727_v40 = vsel %vm720_vm7, %v2063_v39, 0.0 }
 0x2b9   : > { %728 = vadd.xlane.f32.xlu0 %v727_v40 }
 0x2cf   : > { %816 = vrot.lane.b32.xlu0 %v2583_v14, %s2300_s20  ;;  %s1648_s20 = sshll.u32 %s441_s23, 4  ;;  %s1649_s20 = int_to_ptr.vmem [resolvable:$true] %s1648_s20 }
 0x342   : > { %v729_v41 = vpop.xlane.xlu0 %728 }
 0x343   : > { %2064 = vrcp.f32 %v729_v41 }
 0x346   : > { %v817_v44 = vpop.permute.xlu0 %816 }
 0x350   : > { %v2065_v42 = vpop.eup %2064 }
 0x351   : > { %v731_v43 = vmul.f32 %v2065_v42, %v2063_v39 }
 0x353   : > { %1904 = vmatmul.mubr.msk.f32.vlgmr.msra.gmra.mxu1 %vm720_vm7, %v731_v43 }
 0x354   : > { %1907 = vmatpush3.xpose.msk.msra.mxu1 %vm640_vm2, %v817_v44  ;;  %1910 = vmatprep.mubr.msk.f32.mxu1 %vm2298_vm0, %v2297_v0 }
 0x355   : > { %1908 = vmatprep.subr.mxu1 %v2297_v0 }
 0x358   : > { %1909 = vmatpush3.xpose.msk.msra.mxu1 %vm640_vm2, %v815_v45  ;;  %v1550_v45 = vld [vmem:[#allocation10 + $0x18] sm:$0xff] }
 0x359   : > { %1925 = vmatprep.subr.mxu1 %v2297_v0 }
 0x35b   : > { %1911 = vmatmul.mubr.msk.f32.vlgmr.msra.gmra.mxu1 %vm640_vm2, %v813_v46 }
 0x35c   : > { %1927 = vmatprep.mubr.msk.f32.mxu1 %vm2298_vm0, %v2297_v0  ;;  %1926 = vmatpush3.msra.mxu1 %v811_v47 }
 0x35d   : > { %1937 = vmatprep.subr.mxu1 %v2297_v0 }
 0x413   : > { %v807_v48 = vpop.f32.mrf.mxu1 }
 0x414   : > { %1928 = vmatmul.mubr.msk.f32.vlgmr.msra.gmra.mxu1 %vm640_vm2, %v807_v48 }
 0x415   : > { %v1905_v49 = vpop.f32.mrf.mxu1  ;;  %1941 = vmatprep.mubr.msk.f32.mxu1 %vm2298_vm0, %v2297_v0 }
 0x41b   : > { %v890_v50 = vpop.f32.mrf.mxu1 }
 0x41c   : > { %v891_v51 = vadd.f32 %v890_v50, %v2616_v31 }
 0x41d   : > { %v1912_v52 = vpop.f32.mrf.mxu1 }
 0x41e   : > { %v894_v53 = vsel %vm720_vm7, %v891_v51, -inf }
 0x41f   : > { %895 = vmax.xlane.f32.xlu1 %v894_v53  ;;  %v1821_v53 = vld [vmem:[%s2748_s8] ss:$0 sm:$0xff] }
 0x430   : > { %907 = vrot.lane.b32.xlu1 %v2583_v14, %s2302_s17 }
 0x434   : > { %1135 = vrot.lane.b32.xlu1 %v2583_v14, %s2303_s21 }
 0x438   : > { %1133 = vrot.lane.b32.xlu1 %v2592_v19, %s2303_s21 }
 0x43c   : > { %1131 = vrot.lane.b32.xlu1 %v2594_v20, %s2303_s21  ;;  %s2216_s21 = sshll.u32 %s2307_s13, 4  ;;  %s2217_s21 = int_to_ptr.vmem [resolvable:$false] %s2216_s21 }
 0x43d   : > { %s2218_s25 = scalar_lea.vmem %s2217_s21, 256  ;;  %p2219_p10 = scmp.lt.s32.totalorder %s1649_s20, %s2217_s21 }
 0x440   : > { %1382 = vrot.lane.b32.xlu1 %v2583_v14, %s2304_s29 }
 0x444   : > { %1378 = vrot.lane.b32.xlu1 %v2594_v20, %s2304_s29 }
 0x4a8   : > { %v896_v54 = vpop.xlane.xlu1 %895 }
 0x4a9   : > { %v897_v55 = vsub.f32 %v891_v51, %v896_v54 }
 0x4ab   : > { %v898_v56 = vmul.f32 1.442695, %v897_v55 }
 0x4ac   : > { %v908_v57 = vpop.permute.xlu1 %907 }
 0x4ad   : > { %2066 = vpow2.f32 %v898_v56  ;;  %1914 = vmatpush3.msra.mxu0 %v908_v57 }
 0x4ae   : > { %1915 = vmatprep.subr.mxu0 %v2297_v0 }
 0x4b0   : > { %v1136_v4 = vpop.permute.xlu1 %1135 }
 0x4b4   : > { %v1134_v5 = vpop.permute.xlu1 %1133 }
 0x4b8   : > { %v1132_v8 = vpop.permute.xlu1 %1131 }
 0x4ba   : > { %v2067_v58 = vpop.eup %2066 }
 0x4bb   : > { %v900_v59 = vsel %vm720_vm7, %v2067_v58, 0.0 }
 0x4bc   : > { %901 = vadd.xlane.f32.xlu0 %v900_v59  ;;  %v1383_v9 = vpop.permute.xlu1 %1382 }
 0x4c0   : > { %v1379_v11 = vpop.permute.xlu1 %1378 }
 0x4d2   : > { %905 = vrot.lane.b32.xlu0 %v2592_v19, %s2302_s17  ;;  %s2212_s17 = scalar_lea.vmem %s1649_s20, 128 }
 0x4d3   : > { %p2213_p9 = scmp.ne.s32.totalorder %s1649_s20, %s2212_s17  ;;  %p2220_p4 = scmp.lt.s32.totalorder %s2218_s25, %s2212_s17 }
 0x4d4   : > { %v2648_v60 = vpop.f32.mrf.mxu1 }
 0x4d5   : > { %p2214_p0 = pnand %p2213_p9, %p2777_p13  ;;  %p2221_p6 = por %p2220_p4, %p2219_p10 }
 0x4d6   : > { %1380 = vrot.lane.b32.xlu0 %v2592_v19, %s2304_s29  ;;  %v1929_v61 = vpop.f32.mrf.mxu1 }
 0x4d7   : > { %p2215_p11 = pneg %p2214_p0 }
 0x4d9   : > { %p2222_p5 = pnand %p2221_p6, %p2215_p11 }
 0x545   : > { %v902_v62 = vpop.xlane.xlu0 %901 }
 0x546   : > { %2068 = vrcp.f32 %v902_v62 }
 0x549   : > { %v906_v63 = vpop.permute.xlu0 %905 }
 0x54a   : > { %1916 = vmatpush3.msra.mxu0 %v906_v63 }
 0x54b   : > { %1920 = vmatprep.subr.mxu0 %v2297_v0 }
 0x54d   : > { %v1381_v10 = vpop.permute.xlu0 %1380 }
 0x553   : > { %v2069_v1 = vpop.eup %2068 }
 0x554   : > { %v904_v2 = vmul.f32 %v2069_v1, %v2067_v58 }
 0x556   : > { %1918 = vmatmul.mubr.msk.f32.vlgmr.msra.gmra.mxu0 %vm720_vm7, %v904_v2 }
 0x557   : > { %1921 = vmatpush3.msra.mxu0 %v984_v3  ;;  %1922 = vmatprep.mubr.msk.f32.mxu0 %vm2298_vm0, %v2297_v0 }
 0x558   : > { %1930 = vmatprep.subr.mxu0 %v2297_v0 }
 0x616   : > { %v980_v6 = vpop.f32.mrf.mxu0 }
 0x617   : > { %1923 = vmatmul.mubr.msk.f32.vlgmr.msra.gmra.mxu0 %vm640_vm2, %v980_v6 }
 0x618   : > { %1931 = vmatpush3.xpose.msk.msra.mxu0 %vm640_vm2, %v1136_v4  ;;  %v1919_v7 = vpop.f32.mrf.mxu0  ;;  %1934 = vmatprep.mubr.msk.f32.mxu0 %vm2298_vm0, %v2297_v0 }
 0x619   : > { %1932 = vmatprep.subr.mxu0 %v2297_v0 }
 0x61c   : > { %1933 = vmatpush3.xpose.msk.msra.mxu0 %vm640_vm2, %v1134_v5 }
 0x61d   : > { %1949 = vmatprep.subr.mxu0 %v2297_v0 }
 0x61f   : > { %1935 = vmatmul.mubr.msk.f32.vlgmr.msra.gmra.mxu0 %vm640_vm2, %v1132_v8 }
 0x620   : > { %1950 = vmatpush3.xpose.msk.msra.mxu0 %vm640_vm2, %v1383_v9  ;;  %1953 = vmatprep.mubr.msk.f32.mxu0 %vm2298_vm0, %v2297_v0 }
 0x621   : > { %1951 = vmatprep.subr.mxu0 %v2297_v0 }
 0x624   : > { %1952 = vmatpush3.xpose.msk.msra.mxu0 %vm640_vm2, %v1381_v10 }
 0x627   : > { %1954 = vmatmul.mubr.msk.f32.vlgmr.msra.gmra.mxu0 %vm640_vm2, %v1379_v11 }
 0x6d7   : > { %v2670_v12 = vpop.f32.mrf.mxu0 }
 0x6d8   : > { %v1128_v46 = vadd.f32 %v2648_v60, %v2670_v12 }
 0x6d9   : > { %v1924_v13 = vpop.f32.mrf.mxu0 }
 0x6df   : > { %v1209_v15 = vpop.f32.mrf.mxu0 }
 0x6e0   : > { %v1210_v16 = vadd.f32 %v1209_v15, %v2616_v31 }
 0x6e1   : > { %v1936_v17 = vpop.f32.mrf.mxu0 }
 0x6e2   : > { %v1213_v18 = vsel %vm720_vm7, %v1210_v16, -inf }
 0x6e3   : > { %1214 = vmax.xlane.f32.xlu0 %v1213_v18 }
 0x6e7   : > { %v1456_v20 = vpop.f32.mrf.mxu0 }
 0x6e8   : > { %v1457_v22 = vadd.f32 %v1456_v20, %v2616_v31 }
 0x6e9   : > { %v1955_v21 = vpop.f32.mrf.mxu0 }
 0x6ea   : > { %v1460_v23 = vsel %vm720_vm7, %v1457_v22, -inf }
 0x6f9   : > { %1226 = vrot.lane.b32.xlu0 %v2583_v14, %s2305_s18 }
 0x718   : > { %1461 = vmax.xlane.f32.xlu0 %v1460_v23 }
 0x72e   : > { %1473 = vrot.lane.b32.xlu0 %v2583_v14, %s2306_s15 }
 0x76c   : > { %v1215_v24 = vpop.xlane.xlu0 %1214 }
 0x76d   : > { %v1216_v25 = vsub.f32 %v1210_v16, %v1215_v24 }
 0x76f   : > { %v1217_v26 = vmul.f32 1.442695, %v1216_v25 }
 0x770   : > { %v1227_v27 = vpop.permute.xlu0 %1226 }
 0x771   : > { %2070 = vpow2.f32 %v1217_v26  ;;  %1938 = vmatpush3.msra.mxu1 %v1227_v27 }
 0x772   : > { %1939 = vmatprep.subr.mxu1 %v2297_v0 }
 0x77e   : > { %v2071_v28 = vpop.eup %2070 }
 0x77f   : > { %v1219_v29 = vsel %vm720_vm7, %v2071_v28, 0.0 }
 0x780   : > { %1220 = vadd.xlane.f32.xlu1 %v1219_v29 }
 0x791   : > { %1224 = vrot.lane.b32.xlu1 %v2592_v19, %s2305_s18 }
 0x7a1   : > { %v1462_v30 = vpop.xlane.xlu0 %1461 }
 0x7a2   : > { %v1463_v31 = vsub.f32 %v1457_v22, %v1462_v30 }
 0x7a4   : > { %v1464_v32 = vmul.f32 1.442695, %v1463_v31 }
 0x7a5   : > { %v1474_v41 = vpop.permute.xlu0 %1473 }
 0x7a6   : > { %2072 = vpow2.f32 %v1464_v32 }
 0x7b3   : > { %v2073_v33 = vpop.eup %2072 }
 0x7b4   : > { %v1466_v14 = vsel %vm720_vm7, %v2073_v33, 0.0 }
 0x7b5   : > { %1467 = vadd.xlane.f32.xlu1 %v1466_v14 }
 0x7c6   : > { %1471 = vrot.lane.b32.xlu1 %v2592_v19, %s2306_s15 }
 0x809   : > { %v1221_v34 = vpop.xlane.xlu1 %1220 }
 0x80a   : > { %2074 = vrcp.f32 %v1221_v34 }
 0x80d   : > { %v1225_v35 = vpop.permute.xlu1 %1224 }
 0x80e   : > { %1940 = vmatpush3.msra.mxu1 %v1225_v35 }
 0x80f   : > { %1944 = vmatprep.subr.mxu1 %v2297_v0 }
 0x817   : > { %v2075_v36 = vpop.eup %2074 }
 0x818   : > { %v1223_v37 = vmul.f32 %v2075_v36, %v2071_v28 }
 0x81a   : > { %1942 = vmatmul.mubr.msk.f32.vlgmr.msra.gmra.mxu1 %vm720_vm7, %v1223_v37 }
 0x81b   : > { %1945 = vmatpush3.msra.mxu1 %v1303_v38  ;;  %1946 = vmatprep.mubr.msk.f32.mxu1 %vm2298_vm0, %v2297_v0 }
 0x81c   : > { %1956 = vmatprep.subr.mxu1 %v2297_v0 }
 0x83e   : > { %v1468_v39 = vpop.xlane.xlu1 %1467 }
 0x83f   : > { %2076 = vrcp.f32 %v1468_v39 }
 0x842   : > { %v1472_v43 = vpop.permute.xlu1 %1471 }
 0x84c   : > { %v2077_v19 = vpop.eup %2076 }
 0x84d   : > { %v1470_v44 = vmul.f32 %v2077_v19, %v2073_v33 }
 0x8da   : > { %v1299_v40 = vpop.f32.mrf.mxu1 }
 0x8db   : > { %1947 = vmatmul.mubr.msk.f32.vlgmr.msra.gmra.mxu1 %vm640_vm2, %v1299_v40 }
 0x8dc   : > { %1957 = vmatpush3.msra.mxu1 %v1474_v41  ;;  %v1943_v42 = vpop.f32.mrf.mxu1  ;;  %1960 = vmatprep.mubr.msk.f32.mxu1 %vm2298_vm0, %v2297_v0 }
 0x8dd   : > { %1958 = vmatprep.subr.mxu1 %v2297_v0 }
 0x8de   : > { %1959 = vmatpush3.msra.mxu1 %v1472_v43 }
 0x8df   : > { %1961 = vmatmul.mubr.msk.f32.vlgmr.msra.gmra.mxu1 %vm720_vm7, %v1470_v44  ;;  %1963 = vmatprep.subr.mxu1 %v2297_v0 }
 0x8e0   : > { %1965 = vmatprep.mubr.msk.f32.mxu1 %vm2298_vm0, %v2297_v0  ;;  %1964 = vmatpush3.msra.mxu1 %v1550_v45 }
 0x99b   : > { %v1373_v47 = vpop.f32.mrf.mxu1 }
 0x99c   : > { %v1377_v48 = vadd.f32 %v1373_v47, %v1128_v46 }
 0x99d   : > { %v1948_v49 = vpop.f32.mrf.mxu1 }
 0x99f   : > { %v1546_v50 = vpop.f32.mrf.mxu1 }
 0x9a0   : > { %1966 = vmatmul.mubr.msk.f32.vlgmr.msra.gmra.mxu1 %vm640_vm2, %v1546_v50 }
 0x9a1   : > { %v1962_v51 = vpop.f32.mrf.mxu1 }
 0xa60   : > { %v1620_v52 = vpop.f32.mrf.mxu1 }
 0xa61   : > { %v1624_v0 = vadd.f32 %v1620_v52, %v1377_v48 }
 0xa62   : > { %v1967_v54 = vpop.f32.mrf.mxu1 }
 0xa63   : > { %v1632_v55 = vadd.f32 %v1821_v53, %v1624_v0 }
 0xa65   : > { %1633 = vst.msk [vmem:[%s441_s23] sm:$0xff] %vm459_vm1, %v1632_v55 }
 0xa66   : > { %2225 = shalt.err (!%p2222_p5)
}
 0xa67   : > { %s2226_s29 = scalar_lea.hbm %s1646_s28, 128  ;;  %s2230_s15 = scalar_lea.hbm %s2749_s9, 256 }
 0xa68   : > { %p2227_p8 = scmp.ne.s32.totalorder %s1646_s28, %s2226_s29  ;;  %p2231_p7 = scmp.lt.s32.totalorder %s1646_s28, %s2749_s9 }
 0xa69   : > { %p2232_p1 = scmp.lt.s32.totalorder %s2230_s15, %s2226_s29 }
 0xa6a   : > { %p2228_p2 = pnand %p2227_p8, %p2777_p13 }
 0xa6b   : > { %p2233_p12 = por %p2232_p1, %p2231_p7 }
 0xa6c   : > { %p2229_p3 = pneg %p2228_p2 }
 0xa6e   : > { %p2234_p9 = pnand %p2233_p12, %p2229_p3 }
 0xa70   : > { %2237 = shalt.err (!%p2234_p9)
}
 0xa71   : > { %1984 = dma.vmem_to_hbm [thread:$0]  (%p2777_p13), %s1649_s20, 128, %s1646_s28, %s1635_s26  }
 0xa72 PF: > { %s1660_s7 = sand.u32 1, %s2276_s30   ;;  %p2778_p0 = scmp.ne.s32.totalorder %s2760_s16, 0 }
 0xa73   : > { %p2779_p11 = scmp.ge.s32.totalorder %s2288_s12, 2  ;;  %s1661_s23 = scalar_lea.sflag [#allocation4], %s1660_s7 }
 0xa75   : > { %p2004_p10 = pnand %p2779_p11, %p2778_p0 }
 0xa77   : > { %p2005_p4 = pneg %p2004_p10 }
 0xa79   : > { %2271 = dma.done.wait (%p2005_p4), %s1661_s23, 128  }
 0xa7a   : > { %2273 = vsyncadd (%p2005_p4), %s1661_s23, 4294967168  ;;  %s2780_s24 = sld [smem:[#allocation17_spill]]  ;;  %p26_p6 = scmp.ge.s32.totalorder %s2447_s22, 4  }
 0xa7b   : > { %s2781_s30 = smov %s2280_s10  ;;  %s2782_s10 = smov %s2284_s11 }
 0xa7c   : > { %s2784_s12 = smov %s2447_s22  ;;  %28 = sbr.rel (!%p26_p6) target bundleno = 12 (0xc), region = 129 }
 0xa80   : > { %s2783_s11 = smov %s2780_s24 }
 0xa81   :  { %1666 = vsyncpa [#allocation3], 1 }
 0xa82   :  { %1668 = vsyncpa [#allocation3 + $0x1], 1 }
 0xa83   :  { %1669 = vsyncpa [#allocation6], 1 }
 0xa84   :  { %1671 = vsyncpa [#allocation6 + $0x1], 1 }
 0xa85   :  { %1672 = vsyncpa [#allocation9], 1 }
 0xa86   :  { %1673 = vsyncpa [#allocation4], 1 }
 0xa87   :  { %1675 = vsyncpa [#allocation4 + $0x1], 1 }

</bundles_post_ra>
